<compile_context>
chip_gen: v7x
topology: tpu7x:2x2x1
jax: 0.10.0
libtpu: 0.0.40
codegen_flags: <defaults>
</compile_context>

<pallas_src>
import functools

import jax
import jax.numpy as jnp
from jax.experimental import pallas as pl
from jax.experimental.pallas import tpu as pltpu

BN_EPS = 1e-5


def basic_block_kernel(x_ref, w_ref, gb_ref, o_ref, acc_ref, *, inv_b):
    """One (Dout tile, Din tile) grid step of Linear + BN(batch stats) + ReLU.

    x_ref : (B, tk)  bf16    w_ref : (tk, tn) bf16
    gb_ref: (2, tn)  f32     o_ref : (B, tn)  f32     acc_ref: (B, tn) f32
    """
    k = pl.program_id(1)

    @pl.when(k == 0)
    def _init():
        acc_ref[...] = jnp.zeros_like(acc_ref)

    # bf16 inputs on the MXU, f32 accumulation in VMEM scratch.
    acc_ref[...] += jnp.dot(x_ref[...], w_ref[...],
                            preferred_element_type=jnp.float32)

    @pl.when(k == pl.num_programs(1) - 1)
    def _finalize():
        y = acc_ref[...]                                     # (B, tn) f32
        # Two-pass (centered) batch statistics: cheap sublane reductions,
        # keeps the MXU/vex slot free and avoids one-pass cancellation.
        mean = jnp.sum(y, axis=0, keepdims=True) * inv_b     # (1, tn)
        centered = y - mean
        var = jnp.sum(centered * centered, axis=0, keepdims=True) * inv_b

        gamma = gb_ref[0:1, :]                               # (1, tn)
        beta = gb_ref[1:2, :]                                # (1, tn)
        # Fold BN affine into per-channel scale/shift (EUP rsqrt, tiny (1,tn)
        # precompute); per-element epilogue is just fma + max.
        scale = gamma * jax.lax.rsqrt(var + BN_EPS)
        shift = beta - mean * scale
        o_ref[...] = jnp.maximum(y * scale + shift, 0.0).astype(o_ref.dtype)


def basic_block_forward(x, w, gamma, beta, *, tn=None, tk=None):
    """Fused BasicBlock forward (training-mode BN, biased variance, eps=1e-5).

    x: (B, Din) f32/bf16, w: (Din, Dout) pre-transposed Linear weight,
    gamma/beta: (Dout,).  Returns (B, Dout) f32.
    """
    B, Din = x.shape
    Kd, Dout = w.shape
    assert Kd == Din, (Kd, Din)
    assert B > 1, "training-mode BatchNorm1d requires batch > 1"

    # 256-aligned tiles feed the v6e/v7x 256x256 MXU fully (128 also fine on
    # v5e); shrink to the full extent for small problems.
    if tn is None:
        tn = Dout if Dout <= 256 else 256
    if tk is None:
        tk = Din if Din <= 256 else 256
    assert Dout % tn == 0 and Din % tk == 0, (Din, Dout, tk, tn)

    # bf16 streaming of the bandwidth-bound operands; BN params stay f32.
    x_bf = x.astype(jnp.bfloat16)
    w_bf = w.astype(jnp.bfloat16)
    gb = jnp.stack([gamma, beta], axis=0).astype(jnp.float32)   # (2, Dout)

    grid = (Dout // tn, Din // tk)

    # Per-step VMEM: double-buffered x/w/gb/out tiles + the resident f32 acc.
    per_step_bytes = (2 * B * tk * 2          # x tile, bf16, double-buffered
                      + 2 * tk * tn * 2       # w tile, bf16, double-buffered
                      + 2 * 2 * tn * 4        # gamma/beta tile
                      + 2 * B * tn * 4        # out tile
                      + B * tn * 4)           # accumulator scratch
    vmem_limit = int(min(64 * 1024 * 1024,
                         max(32 * 1024 * 1024, 2 * per_step_bytes)))

    kernel = functools.partial(basic_block_kernel, inv_b=float(1.0 / B))

    # TODO(synk): BatchNorm1d running_mean/running_var buffer updates (training
    # side-effect) are not materialized; only the forward output is produced.
    return pl.pallas_call(
        kernel,
        out_shape=jax.ShapeDtypeStruct((B, Dout), jnp.float32),
        grid_spec=pltpu.PrefetchScalarGridSpec(
            num_scalar_prefetch=0,
            grid=grid,
            in_specs=[
                pl.BlockSpec((B, tk), lambda j, k: (0, k)),   # activations
                pl.BlockSpec((tk, tn), lambda j, k: (k, j)),  # weight stream
                pl.BlockSpec((2, tn), lambda j, k: (0, j)),   # gamma/beta
            ],
            out_specs=pl.BlockSpec((B, tn), lambda j, k: (0, j)),
            scratch_shapes=[pltpu.VMEM((B, tn), jnp.float32)],
        ),
        compiler_params=pltpu.CompilerParams(
            dimension_semantics=("parallel", "arbitrary"),
            vmem_limit_bytes=vmem_limit,
        ),
        cost_estimate=pl.CostEstimate(
            flops=2 * B * Din * Dout,
            transcendentals=Dout,
            bytes_accessed=(B * Din * 2 * (Dout // tn) + Din * Dout * 2
                            + 2 * Dout * 4 + B * Dout * 4),
        ),
    )(x_bf, w_bf, gb)


def init_basic_block_params(key, inp, out):
    """Synthetic parameters matching the PyTorch module shapes.

    Weight stored pre-transposed as (inp, out).  nn.Linear's bias is not
    created: it is mathematically cancelled by the BN mean subtraction.
    """
    kw, kg, kb = jax.random.split(key, 3)
    bound = 1.0 / jnp.sqrt(jnp.float32(inp))
    w = jax.random.uniform(kw, (inp, out), jnp.float32, -bound, bound)
    gamma = 1.0 + 0.1 * jax.random.normal(kg, (out,), jnp.float32)
    beta = 0.1 * jax.random.normal(kb, (out,), jnp.float32)
    return w, gamma, beta


def _reference_forward(x_bf, w_bf, gamma, beta):
    """Pure-JAX reference (same bf16 inputs, f32 accumulation, train-mode BN)."""
    y = jnp.dot(x_bf, w_bf, preferred_element_type=jnp.float32)
    mean = jnp.mean(y, axis=0, keepdims=True)
    var = jnp.mean((y - mean) ** 2, axis=0, keepdims=True)
    y = (y - mean) * jax.lax.rsqrt(var + BN_EPS) * gamma + beta
    return jnp.maximum(y, 0.0)


if __name__ == "__main__":
    key = jax.random.PRNGKey(0)

    # Small but grid-exercising shapes: 256-tiles -> grid (2, 2).
    batch, inp, out = 8, 512, 512

    key, kx, kp = jax.random.split(key, 3)
    x = jax.random.normal(kx, (batch, inp), jnp.float32)
    w, gamma, beta = init_basic_block_params(kp, inp, out)

    y = basic_block_forward(x, w, gamma, beta)
    y = jax.block_until_ready(y)

    assert y.shape == (batch, out), y.shape
    assert bool(jnp.all(jnp.isfinite(y)))

    y_ref = _reference_forward(x.astype(jnp.bfloat16), w.astype(jnp.bfloat16),
                               gamma, beta)
    max_err = float(jnp.max(jnp.abs(y - y_ref)))
    assert jnp.allclose(y, y_ref, atol=1e-3, rtol=1e-3), max_err

    print("KERNEL_OK")
</pallas_src>

<mosaic_0001>
module attributes {stable_mosaic.version = 11 : i64} {
  func.func @basic_block_kernel(%arg0: i32, %arg1: i32, %arg2: memref<8x256xbf16, #tpu.memory_space<vmem>>, %arg3: memref<256x256xbf16, #tpu.memory_space<vmem>>, %arg4: memref<2x256xf32, #tpu.memory_space<vmem>>, %arg5: memref<8x256xf32, #tpu.memory_space<vmem>>, %arg6: memref<8x256xf32, #tpu.memory_space<vmem>>) attributes {dimension_semantics = [#tpu.dimension_semantics<parallel>, #tpu.dimension_semantics<arbitrary>], iteration_bounds = array<i64: 2, 2>, scalar_prefetch = 0 : i64, scratch_operands = 1 : i64, tpu.core_type = #tpu.core_type<tc>, window_params = [{transform_indices = @transform_0, window_bounds = array<i64: 8, 256>}, {transform_indices = @transform_1, window_bounds = array<i64: 256, 256>}, {transform_indices = @transform_2, window_bounds = array<i64: 2, 256>}, {transform_indices = @transform_3, window_bounds = array<i64: 8, 256>}]} {
    %c0_i32 = arith.constant 0 : i32
    %0 = arith.cmpi eq, %arg1, %c0_i32 : i32
    %1 = arith.extui %0 : i1 to i32
    %c0_i32_0 = arith.constant 0 : i32
    %2 = arith.cmpi ne, %1, %c0_i32_0 : i32
    scf.if %2 {
      %cst_9 = arith.constant 0.000000e+00 : f32
      %12 = vector.broadcast %cst_9 : f32 to vector<8x256xf32>
      %c0_10 = arith.constant 0 : index
      %c0_11 = arith.constant 0 : index
      %13 = vector.load %arg6[%c0_10, %c0_11] : memref<8x256xf32, #tpu.memory_space<vmem>>, vector<8x256xf32>
      tpu.vector_store %arg6[%c0_10, %c0_11], %12 {strides = array<i32>} : memref<8x256xf32, #tpu.memory_space<vmem>>, vector<8x256xf32>,
    } else {
    }
    %c0 = arith.constant 0 : index
    %c0_1 = arith.constant 0 : index
    %3 = vector.load %arg6[%c0, %c0_1] : memref<8x256xf32, #tpu.memory_space<vmem>>, vector<8x256xf32>
    %c0_2 = arith.constant 0 : index
    %c0_3 = arith.constant 0 : index
    %4 = vector.load %arg2[%c0_2, %c0_3] : memref<8x256xbf16, #tpu.memory_space<vmem>>, vector<8x256xbf16>
    %c0_4 = arith.constant 0 : index
    %c0_5 = arith.constant 0 : index
    %5 = vector.load %arg3[%c0_4, %c0_5] : memref<256x256xbf16, #tpu.memory_space<vmem>>, vector<256x256xbf16>
    %cst = arith.constant dense<0.000000e+00> : vector<8x256xf32>
    %6 = tpu.matmul %4, %5, %cst {dimension_numbers = #tpu.dot_dimension_numbers<[1], [0], [0], [1], [0, 0, 1, 1], [], []>} : vector<8x256xbf16>, vector<256x256xbf16>, vector<8x256xf32> -> vector<8x256xf32>
    %7 = arith.addf %3, %6 : vector<8x256xf32>
    %c0_6 = arith.constant 0 : index
    %c0_7 = arith.constant 0 : index
    %8 = vector.load %arg6[%c0_6, %c0_7] : memref<8x256xf32, #tpu.memory_space<vmem>>, vector<8x256xf32>
    tpu.vector_store %arg6[%c0_6, %c0_7], %7 {strides = array<i32>} : memref<8x256xf32, #tpu.memory_space<vmem>>, vector<8x256xf32>,
    %c1_i32 = arith.constant 1 : i32
    %9 = arith.cmpi eq, %arg1, %c1_i32 : i32
    %10 = arith.extui %9 : i1 to i32
    %c0_i32_8 = arith.constant 0 : i32
    %11 = arith.cmpi ne, %10, %c0_i32_8 : i32
    scf.if %11 {
      %c0_9 = arith.constant 0 : index
      %c0_10 = arith.constant 0 : index
      %12 = vector.load %arg6[%c0_9, %c0_10] : memref<8x256xf32, #tpu.memory_space<vmem>>, vector<8x256xf32>
      %cst_11 = arith.constant dense<0.000000e+00> : vector<256xf32>
      %13 = vector.multi_reduction <add>, %12, %cst_11 [0] : vector<8x256xf32> to vector<256xf32>
      %14 = vector.shape_cast %13 : vector<256xf32> to vector<1x256xf32>
      %cst_12 = arith.constant 1.250000e-01 : f32
      %15 = vector.broadcast %cst_12 : f32 to vector<1x256xf32>
      %16 = arith.mulf %14, %15 : vector<1x256xf32>
      %17 = vector.broadcast %16 : vector<1x256xf32> to vector<8x256xf32>
      %18 = arith.subf %12, %17 : vector<8x256xf32>
      %19 = arith.mulf %18, %18 : vector<8x256xf32>
      %cst_13 = arith.constant dense<0.000000e+00> : vector<256xf32>
      %20 = vector.multi_reduction <add>, %19, %cst_13 [0] : vector<8x256xf32> to vector<256xf32>
      %21 = vector.shape_cast %20 : vector<256xf32> to vector<1x256xf32>
      %cst_14 = arith.constant 1.250000e-01 : f32
      %22 = vector.broadcast %cst_14 : f32 to vector<1x256xf32>
      %23 = arith.mulf %21, %22 : vector<1x256xf32>
      %c0_15 = arith.constant 0 : index
      %c0_16 = arith.constant 0 : index
      %24 = vector.load %arg4[%c0_15, %c0_16] : memref<2x256xf32, #tpu.memory_space<vmem>>, vector<1x256xf32>
      %c1 = arith.constant 1 : index
      %c0_17 = arith.constant 0 : index
      %25 = vector.load %arg4[%c1, %c0_17] : memref<2x256xf32, #tpu.memory_space<vmem>>, vector<1x256xf32>
      %cst_18 = arith.constant 9.99999974E-6 : f32
      %26 = vector.broadcast %cst_18 : f32 to vector<1x256xf32>
      %27 = arith.addf %23, %26 : vector<1x256xf32>
      %28 = math.rsqrt %27 : vector<1x256xf32>
      %29 = arith.mulf %24, %28 : vector<1x256xf32>
      %30 = arith.mulf %16, %29 : vector<1x256xf32>
      %31 = arith.subf %25, %30 : vector<1x256xf32>
      %32 = vector.broadcast %29 : vector<1x256xf32> to vector<8x256xf32>
      %33 = arith.mulf %12, %32 : vector<8x256xf32>
      %34 = vector.broadcast %31 : vector<1x256xf32> to vector<8x256xf32>
      %35 = arith.addf %33, %34 : vector<8x256xf32>
      %cst_19 = arith.constant 0.000000e+00 : f32
      %36 = vector.broadcast %cst_19 : f32 to vector<8x256xf32>
      %37 = arith.maximumf %35, %36 : vector<8x256xf32>
      %c0_20 = arith.constant 0 : index
      %c0_21 = arith.constant 0 : index
      %38 = vector.load %arg5[%c0_20, %c0_21] : memref<8x256xf32, #tpu.memory_space<vmem>>, vector<8x256xf32>
      tpu.vector_store %arg5[%c0_20, %c0_21], %37 {strides = array<i32>} : memref<8x256xf32, #tpu.memory_space<vmem>>, vector<8x256xf32>,
    } else {
    }
    return
  }
  func.func @transform_0(%arg0: i32, %arg1: i32) -> (i32, i32) {
    %c0_i32 = arith.constant 0 : i32
    %c0_i32_0 = arith.constant 0 : i32
    return %c0_i32, %arg1 : i32, i32
  }
  func.func @transform_1(%arg0: i32, %arg1: i32) -> (i32, i32) {
    %c0_i32 = arith.constant 0 : i32
    return %arg1, %arg0 : i32, i32
  }
  func.func @transform_2(%arg0: i32, %arg1: i32) -> (i32, i32) {
    %c0_i32 = arith.constant 0 : i32
    %c0_i32_0 = arith.constant 0 : i32
    return %c0_i32, %arg0 : i32, i32
  }
  func.func @transform_3(%arg0: i32, %arg1: i32) -> (i32, i32) {
    %c0_i32 = arith.constant 0 : i32
    %c0_i32_0 = arith.constant 0 : i32
    return %c0_i32, %arg0 : i32, i32
  }
}

</mosaic_0001>

<bundles_post_ra>
// kernel: tpu_custom_call.1
= control target key start
LH: loop header
LB: loop body
LE: loop exit
PB: predicated region body
PF: predicated region fallthrough
CT: control target
= control target key end

     0   :  { %s1769_s0 = inlined_call_operand.hbm [shape: bf16[8,512], index: 0, kind: input, shape index: {}]   ;;  %s1770_s1 = inlined_call_operand.hbm [shape: bf16[512,512], index: 1, kind: input, shape index: {}]   ;;  %s1771_s2 = inlined_call_operand.hbm [shape: f32[2,512], index: 2, kind: input, shape index: {}]   ;;  %s1772_s3 = inlined_call_operand.hbm [shape: f32[8,512], index: 3, kind: output, shape index: {}]  }
   0x1   :  { %1785 = sst [smem:[#allocation20_spill]] %s1769_s0 }
   0x2   :  { %1786 = sst [smem:[#allocation21_spill]] %s1770_s1 }
   0x3   :  { %1787 = sst [smem:[#allocation22_spill]] %s1771_s2 }
   0x4   :  { %1788 = sst [smem:[#allocation23_spill]] %s1772_s3 }
   0x5   :  { %8 = vsyncpa [#allocation4], 0 }
   0x6   :  { %10 = vsyncpa [#allocation4 + $0x1], 0 }
   0x7   :  { %11 = vsyncpa [#allocation7], 0 }
   0x8   :  { %13 = vsyncpa [#allocation7 + $0x1], 0 }
   0x9   :  { %14 = vsyncpa [#allocation5], 0 }
   0xa   :  { %16 = vsyncpa [#allocation5 + $0x1], 0  ;;  %s1330_s12 = smov 0   ;;  %s1332_s13 = smov 0  }
   0xb   :  { %s1334_s14 = smov 0   ;;  %s1336_s15 = smov 0  }
   0xc   :  { %s1338_s16 = smov 0   ;;  %s1340_s17 = smov 0  }
   0xd   :  { %s1342_s18 = smov 0   ;;  %s1344_s19 = smov 0  }
   0xe   :  { %s1346_s20 = smov 0   ;;  %s1348_s21 = smov 0  }
   0xf   :  { %s1350_s22 = smov 0   ;;  %s1352_s23 = smov 0  }
  0x10   :  { %s1354_s24 = smov 0   ;;  %s1356_s25 = smov 0  }
  0x11 LB: > { %1789 = sst [smem:[#allocation14_spill]] %s1247_s12  ;;  %s31_s26 = sadd.s32 1, %s1291_s23  ;;  %s1299_s25 = sphi %s1356_s25, %s22_s25   ;;  %s1295_s24 = sphi %s1354_s24, %s1828_s24   ;;  %s1291_s23 = sphi %s1352_s23, %s1840_s23   ;;  %s1287_s22 = sphi %s1350_s22, %s1826_s22   ;;  %s1283_s21 = sphi %s1348_s21, %s1839_s21   ;;  %s1279_s20 = sphi %s1346_s20, %s1838_s20   ;;  %s1275_s19 = sphi %s1344_s19, %s1837_s19   ;;  %s1271_s18 = sphi %s1342_s18, %s1836_s18   ;;  %s1267_s17 = sphi %s1340_s17, %s1835_s17   ;;  %s1263_s16 = sphi %s1338_s16, %s1834_s16   ;;  %s1259_s15 = sphi %s1336_s15, %s1833_s15   ;;  %s1255_s14 = sphi %s1334_s14, %s1832_s14   ;;  %s1251_s13 = sphi %s1332_s13, %s1831_s13   ;;  %s1247_s12 = sphi %s1330_s12, %s1830_s12  }
  0x12   : > { %1790 = sst [smem:[#allocation15_spill]] %s1283_s21  ;;  %s34_s27 = sadd.s32 1, %s1295_s24 }
  0x13   : > { %1791 = sst [smem:[#allocation16_spill]] %s1287_s22  ;;  %p32_p0 = scmp.ge.s32.totalorder %s31_s26, 2 }
  0x14   : > { %1792 = sst [smem:[#allocation17_spill]] %s1295_s24  ;;  %p1779_p1 = scmp.eq.s32.totalorder %s1299_s25, 0 }
  0x15   : > { %s69_s28 = sadd.s32 1, %s1267_s17  ;;  %p76_p2 = scmp.ne.s32.totalorder %s1267_s17, %s1263_s16 }
  0x16   : > { %s1842_s26 = smov (%p32_p0, %s31_s26), 0  ;;  %s1844_s27 = smov (!%p32_p0, %s34_s27), %s1295_s24 }
  0x17   : > { %1793 = sst [smem:[#allocation18_spill]] %s1842_s26  ;;  %s1411_s29 = ssub.s32 %s1291_s23, %s1842_s26 }
  0x18   : > { %p1415_p3 = por %p76_p2, %p1779_p1  ;;  %p36_p4 = scmp.ge.s32.totalorder %s1844_s27, 2 }
  0x19   : > { %p1777_p6 = scmp.lt.s32.totalorder %s1299_s25, 4  ;;  %s856_s4 = sshll.u32 %s1291_s23, 7 }
  0x1a   : > { %s1846_s27 = smov (%p36_p4, %s1844_s27), 0  ;;  %s177_s5 = sand.u32 1, %s1299_s25  }
  0x1b   : > { %1795 = sst [smem:[#allocation19_spill]] %s1846_s27  ;;  %s1428_s6 = ssub.s32 %s1295_s24, %s1846_s27 }
  0x1c   : > { %s66_s7 = sor.u32 %s1428_s6, %s1411_s29  ;;  %s179_s8 = sand.u32 1, %s1267_s17  }
  0x1d   : > { %p67_p7 = scmp.eq.s32.totalorder %s66_s7, 0  ;;  %s801_s9 = sshll.u32 %s179_s8, 8 }
  0x1e   : > { %s803_s10 = sshll.u32 %s1295_s24, 1  ;;  %s181_s3 = scalar_lea.vmem [#allocation6], %s801_s9 }
  0x1f   : > { %s1435_s11 = scalar_select %p67_p7, %s1267_s17, %s69_s28  }
  0x20   : > { %s188_s26 = sadd.s32 %s856_s4, %s803_s10  ;;  %s191_s22 = sshll.u32 %s181_s3, 4  ;;  %s1439_s22 = int_to_ptr.vmem [resolvable:$true] %s191_s22 }
  0x21   : > { %s805_s21 = sshll.u32 %s188_s26, 6  ;;  %s1796_s1 = sld [smem:[#allocation21_spill]] }
  0x22   : > { %p1450_p8 = pnand %p1777_p6, %p1415_p3  ;;  %s1454_s3 = scalar_lea.sflag [#allocation7], %s177_s5 }
  0x24   : > { %p1057_p10 = pneg %p1450_p8 }
  0x27   : > { %s1444_s27 = scalar_lea.hbm %s1796_s1, %s805_s21  ;;  %s1060_s21 = scalar_lea.hbm %s1796_s1, 16384 }
  0x28   : > { %s1055_s26 = scalar_lea.hbm %s1444_s27, 4096  ;;  %p1061_p13 = scmp.lt.u32.totalorder %s1444_s27, %s1796_s1 }
  0x29   : > { %p1056_p9 = scmp.ne.s32.totalorder %s1444_s27, %s1055_s26  ;;  %p1062_p0 = scmp.lt.u32.totalorder %s1060_s21, %s1055_s26 }
  0x2a   : > { %p1064_p3 = scmp.lt.u32.totalorder %s1055_s26, %s1444_s27 }
  0x2b   : > { %p1058_p11 = pnand %p1057_p10, %p1056_p9  ;;  %p1063_p2 = por %p1062_p0, %p1061_p13 }
  0x2d   : > { %p1059_p12 = pneg %p1058_p11  ;;  %p1065_p4 = por %p1064_p3, %p1063_p2 }
  0x2f   : > { %p1066_p7 = pnand %p1065_p4, %p1059_p12 }
  0x31   : > { %1069 = shalt.err (!%p1066_p7)
}
  0x32   : > { %s1070_s5 = scalar_lea.vmem %s1439_s22, 4096  ;;  %s1301_s8 = smov [#allocation6]  }
  0x33   : > { %p1071_p9 = scmp.ne.s32.totalorder %s1439_s22, %s1070_s5  ;;  %s1075_s9 = sshll.u32 %s1301_s8, 4  ;;  %s1076_s9 = int_to_ptr.vmem [resolvable:$false] %s1075_s9 }
  0x34   : > { %s1077_s10 = scalar_lea.vmem %s1076_s9, 8192  ;;  %p1078_p5 = scmp.lt.s32.totalorder %s1439_s22, %s1076_s9 }
  0x35   : > { %p1073_p11 = pnand %p1071_p9, %p1057_p10  ;;  %p1079_p13 = scmp.lt.s32.totalorder %s1077_s10, %s1070_s5 }
  0x37   : > { %p1074_p6 = pneg %p1073_p11  ;;  %p1080_p0 = por %p1079_p13, %p1078_p5 }
  0x39   : > { %p1081_p2 = pnand %p1080_p0, %p1074_p6 }
  0x3b   : > { %1084 = shalt.err (!%p1081_p2)
}
  0x3c   : > { %s1302_s26 = smov 256   ;;  %s1303_s2 = smov 128  }
  0x3d   : > { %s1304_s12 = smov 8   ;;  %p809_p5 = scmp.ge.s32.totalorder %s1299_s25, 1 }
  0x3e   : > { %874 = dma.hbm_to_vmem [thread:$0]  (!%p1450_p8), %s1444_s27, 4096, %s1439_s22, %s1454_s3, %s1302_s26, %s1303_s2, %s1304_s12  }
  0x3f   : > { %p218_p6 = scmp.lt.s32.totalorder %s1299_s25, 5  ;;  %s1489_s30 = sadd.s32 4294967295, %s1299_s25  }
  0x40   : > { %p39_p12 = scmp.eq.s32.totalorder %s1411_s29, 0  ;;  %s41_s7 = sadd.s32 1, %s1279_s20 }
  0x41   : > { %p1484_p10 = pnand %p809_p5, %p218_p6  ;;  %p48_p3 = scmp.ne.s32.totalorder %s1279_s20, %s1275_s19 }
  0x42   : > { %p54_p4 = scmp.ne.s32.totalorder %s1275_s19, %s1271_s18  ;;  %p1778_p7 = scmp.eq.s32.totalorder %s1489_s30, 0 }
  0x43   : > { %s1798_s21 = scalar_select %p1484_p10, 1, 0 }
  0x44   : > { %s1498_s28 = scalar_select %p39_p12, %s1279_s20, %s41_s7  }
  0x45   : > { %p50_p8 = por %p1779_p1, %p48_p3  ;;  %s158_s22 = sand.u32 1, %s1279_s20  }
  0x46   : > { %s1799_s0 = sld [smem:[#allocation20_spill]]  ;;  %p1513_p9 = por %p1778_p7, %p54_p4 }
  0x47   : > { %p1801_p11 = scmp.ne.s32.totalorder %s1263_s16, %s1259_s15  ;;  %s798_s9 = sshll.u32 %s158_s22, 3 }
  0x48   : > { %s1800_s29 = scalar_select %p1513_p9, 1, 0 }
  0x49   : > { %p1522_p13 = por %p1801_p11, %p1778_p7  ;;  %p1803_p0 = scmp.lt.s32.totalorder %s1299_s25, 4 }
  0x4a   : > { %s162_s10 = scalar_lea.vmem [#allocation3], %s798_s9  ;;  %s159_s2 = scalar_lea.sflag [#allocation4], %s158_s22 }
  0x4b   : > { %s1802_s18 = scalar_select %p1522_p13, 1, 0 }
  0x4c   : > { %s1509_s8 = scalar_lea.hbm %s1799_s0, %s856_s4  ;;  %p1528_p2 = pnand %p1803_p0, %p50_p8 }
  0x4d   : > { %s170_s26 = sshll.u32 %s162_s10, 4  ;;  %s1085_s12 = scalar_lea.hbm %s1509_s8, 128  ;;  %s1532_s26 = int_to_ptr.vmem [resolvable:$true] %s170_s26 }
  0x4e   : > { %p1086_p5 = scmp.ne.s32.totalorder %s1509_s8, %s1085_s12  ;;  %p1087_p6 = pneg %p1528_p2 }
  0x4f   : > { %s1090_s27 = scalar_lea.hbm %s1799_s0, 256  ;;  %p1091_p4 = scmp.lt.u32.totalorder %s1509_s8, %s1799_s0 }
  0x50   : > { %p1088_p12 = pnand %p1087_p6, %p1086_p5  ;;  %p1092_p8 = scmp.lt.u32.totalorder %s1090_s27, %s1085_s12 }
  0x51   : > { %p1094_p0 = scmp.lt.u32.totalorder %s1085_s12, %s1509_s8 }
  0x52   : > { %p1089_p3 = pneg %p1088_p12  ;;  %p1093_p11 = por %p1092_p8, %p1091_p4 }
  0x54   : > { %p1095_p7 = por %p1094_p0, %p1093_p11 }
  0x56   : > { %p1096_p1 = pnand %p1095_p7, %p1089_p3 }
  0x58   : > { %1099 = shalt.err (!%p1096_p1)
}
  0x59   : > { %s1100_s22 = scalar_lea.vmem %s1532_s26, 128  ;;  %s1305_s9 = smov [#allocation3]  }
  0x5a   : > { %p1101_p5 = scmp.ne.s32.totalorder %s1532_s26, %s1100_s22  ;;  %s1105_s10 = sshll.u32 %s1305_s9, 4  ;;  %s1106_s10 = int_to_ptr.vmem [resolvable:$false] %s1105_s10 }
  0x5b   : > { %s1107_s1 = scalar_lea.vmem %s1106_s10, 256  ;;  %p1108_p9 = scmp.lt.s32.totalorder %s1532_s26, %s1106_s10 }
  0x5c   : > { %p1103_p12 = pnand %p1101_p5, %p1087_p6  ;;  %p1109_p4 = scmp.lt.s32.totalorder %s1107_s1, %s1100_s22 }
  0x5e   : > { %p1104_p13 = pneg %p1103_p12  ;;  %p1110_p8 = por %p1109_p4, %p1108_p9 }
  0x60   : > { %p1111_p11 = pnand %p1110_p8, %p1104_p13 }
  0x62   : > { %1114 = shalt.err (!%p1111_p11)
}
  0x63   : > { %s1805_s12 = sld [smem:[#allocation14_spill]]  ;;  %s795_s15 = sadd.s32 4294967294, %s1299_s25  }
  0x64   : > { %871 = dma.hbm_to_vmem [thread:$0]  (!%p1528_p2), %s1509_s8, 128, %s1532_s26, %s159_s2  }
  0x65   : > { %p93_p1 = scmp.eq.s32.totalorder %s1428_s6, 0  ;;  %s95_s4 = sadd.s32 1, %s1255_s14 }
  0x66   : > { %p102_p7 = scmp.ne.s32.totalorder %s1255_s14, %s1251_s13  ;;  %p1806_p13 = scmp.eq.s32.totalorder %s1299_s25, 0 }
  0x67   : > { %s1567_s7 = scalar_select %p93_p1, %s1255_s14, %s95_s4  }
  0x68   : > { %p104_p6 = por %p102_p7, %p1806_p13  ;;  %p1807_p3 = scmp.eq.s32.totalorder %s1489_s30, 0 }
  0x69   : > { %p108_p9 = scmp.ne.s32.totalorder %s1251_s13, %s1805_s12  ;;  %p132_p5 = scmp.eq.s32.totalorder %s1489_s30, 3 }
  0x6a   : > { %p138_p12 = scmp.eq.s32.totalorder %s795_s15, 3  ;;  %s203_s5 = sand.u32 1, %s1255_s14  }
  0x6b   : > { %p1573_p0 = por %p108_p9, %p1807_p3  ;;  %s858_s22 = sshll.u32 %s1295_s24, 6 }
  0x6c   : > { %p1580_p2 = por %p132_p5, %p102_p7  ;;  %p1584_p4 = por %p138_p12, %p108_p9 }
  0x6d   : > { %s1808_s27 = scalar_select %p1573_p0, 1, 0 }
  0x6e   : > { %s1809_s8 = scalar_select %p1580_p2, 1, 0 }
  0x6f   : > { %s1810_s6 = scalar_select %p1584_p4, 1, 0 }
  0x70   : > { %s806_s26 = sshll.u32 %s203_s5, 2  ;;  %s1811_s10 = sld [smem:[#allocation22_spill]] }
  0x71   : > { %p1812_p8 = scmp.lt.s32.totalorder %s1299_s25, 4  ;;  %s205_s15 = scalar_lea.vmem [#allocation8], %s806_s26 }
  0x72   : > { %s213_s4 = sshll.u32 %s205_s15, 4  ;;  %s214_s4 = int_to_ptr.vmem [resolvable:$true] %s213_s4 }
  0x73   : > { %p1595_p11 = pnand %p1812_p8, %p104_p6 }
  0x75   : > { %p1117_p7 = pneg %p1595_p11 }
  0x76   : > { %s1591_s1 = scalar_lea.hbm %s1811_s10, %s858_s22  ;;  %s1120_s9 = scalar_lea.hbm %s1811_s10, 128 }
  0x77   : > { %s1115_s5 = scalar_lea.hbm %s1591_s1, 64  ;;  %p1121_p6 = scmp.lt.u32.totalorder %s1591_s1, %s1811_s10 }
  0x78   : > { %p1116_p1 = scmp.ne.s32.totalorder %s1591_s1, %s1115_s5  ;;  %p1122_p3 = scmp.lt.u32.totalorder %s1120_s9, %s1115_s5 }
  0x79   : > { %p1124_p12 = scmp.lt.u32.totalorder %s1115_s5, %s1591_s1 }
  0x7a   : > { %p1118_p9 = pnand %p1117_p7, %p1116_p1  ;;  %p1123_p5 = por %p1122_p3, %p1121_p6 }
  0x7c   : > { %p1119_p13 = pneg %p1118_p9  ;;  %p1125_p8 = por %p1124_p12, %p1123_p5 }
  0x7e   : > { %p1126_p4 = pnand %p1125_p8, %p1119_p13 }
  0x80   : > { %1129 = shalt.err (!%p1126_p4)
}
  0x81   : > { %s1130_s26 = scalar_lea.vmem %s214_s4, 64  ;;  %s1306_s15 = smov [#allocation8]  }
  0x82   : > { %p1131_p2 = scmp.ne.s32.totalorder %s214_s4, %s1130_s26  ;;  %s1135_s22 = sshll.u32 %s1306_s15, 4  ;;  %s1136_s22 = int_to_ptr.vmem [resolvable:$false] %s1135_s22 }
  0x83   : > { %s1137_s2 = scalar_lea.vmem %s1136_s22, 128  ;;  %p1138_p0 = scmp.lt.s32.totalorder %s214_s4, %s1136_s22 }
  0x84   : > { %p1133_p1 = pnand %p1131_p2, %p1117_p7  ;;  %p1139_p10 = scmp.lt.s32.totalorder %s1137_s2, %s1130_s26 }
  0x86   : > { %p1134_p9 = pneg %p1133_p1  ;;  %p1140_p3 = por %p1139_p10, %p1138_p0 }
  0x88   : > { %p1141_p6 = pnand %p1140_p3, %p1134_p9 }
  0x8a   : > { %1144 = shalt.err (!%p1141_p6)
}
  0x8b   : > { %877 = dma.hbm_to_vmem [thread:$0]  (!%p1595_p11), %s1591_s1, 64, %s214_s4, %s1454_s3  }
  0x8c   : > { %p1814_p4 = scmp.ne.s32.totalorder %s1798_s21, 0 }
  0x8d   : > { %s224_s0 = sand.u32 (!%p1814_p4), 1, %s1275_s19   ;;  %p1815_p2 = scmp.ne.s32.totalorder (!%p1814_p4), %s1800_s29, 0 }
  0x8e   : > { %222 = sbr.rel (%p1814_p4) target bundleno = 561 (0x231), region = 32  ;;  %s1624_s24 = sshll.u32 (!%p1814_p4), %s224_s0, 3 }
  0x8f   : > { %s225_s5 = scalar_lea.sflag (!%p1814_p4), [#allocation4], %s224_s0  ;;  %s228_s9 = scalar_lea.vmem (!%p1814_p4), [#allocation3], %s1624_s24 }
  0x95   : > { %1230 = dma.done.wait (%p1815_p2), %s225_s5, 128  }
  0x96   : > { %1232 = vsyncadd (%p1815_p2), %s225_s5, 4294967168  ;;  %s233_s3 = sand.u32 1, %s1489_s30   ;;  %s235_s1 = sand.u32 1, %s1263_s16  }
  0x97   : > { %s811_s21 = sshll.u32 %s235_s1, 8  ;;  %s234_s12 = scalar_lea.sflag [#allocation7], %s233_s3 }
  0x98   : > { %s1633_s4 = scalar_lea.vmem [#allocation6], %s811_s21  ;;  %p1816_p10 = scmp.ne.s32.totalorder %s1802_s18, 0 }
  0x9a   : > { %1234 = dma.done.wait (%p1816_p10), %s234_s12, 4096  }
  0x9b   : > { %1236 = vsyncadd (%p1816_p10), %s234_s12, 4294963200  ;;  %s1640_s26 = sand.u32 1, %s1251_s13   ;;  %p1817_p0 = scmp.ne.s32.totalorder %s1808_s27, 0 }
  0x9c   : > { %s812_s29 = sshll.u32 %s1640_s26, 2 }
  0x9d   : > { %s1643_s15 = scalar_lea.vmem [#allocation8], %s812_s29 }
  0x9e   : > { %1238 = dma.done.wait (%p1817_p0), %s234_s12, 64  }
  0x9f   : > { %1240 = vsyncadd (%p1817_p0), %s234_s12, 4294967232  ;;  %s813_s30 = sshll.u32 %s1640_s26, 4  ;;  %s1818_s2 = sld [smem:[#allocation15_spill]] }
  0xa0   : > { %s1650_s22 = scalar_lea.vmem [#allocation9], %s813_s30 }
  0xa5   : > { %p814_p11 = scmp.ne.s32.totalorder %s1818_s2, 0 }
  0xa6   : > { %v1307_v0 = vmov (!%p814_p11), 0.0  }
  0xa7   : > { %287 = sbr.rel (%p814_p11) target bundleno = 174 (0xae), region = 48  ;;  %288 = vst [vmem:[#allocation2] sm:$0xff] (!%p814_p11), %v1307_v0  ;;  %289 = vst [vmem:[#allocation2 + $0x8] sm:$0xff] (!%p814_p11), %v1307_v0 }
  0xae PF: > { %v1001_v1 = vld [vmem:[%s1633_s4 + $0x4] ss:$8 sps:$4 sm:$0xff]   ;;  %v1003_v2 = vld [vmem:[%s1633_s4] ss:$8 sps:$4 sm:$0xff]   ;;  %v1004_v3 = vld [vmem:[%s1633_s4 + $0x14] ss:$8 sps:$4 sm:$0xff]  }
  0xaf   : > { %492 = vmatprep.subr.bf16.mxu0 %v1001_v1  ;;  %v1006_v4 = vld [vmem:[%s1633_s4 + $0x10] ss:$8 sps:$4 sm:$0xff]   ;;  %v1007_v5 = vld [vmem:[%s1633_s4 + $0x24] ss:$8 sps:$4 sm:$0xff]   ;;  %v1009_v6 = vld [vmem:[%s1633_s4 + $0x20] ss:$8 sps:$4 sm:$0xff]  }
  0xb0   : > { %493 = vmatpush1.bf16.msra.mxu0 %v1003_v2  ;;  %v1010_v7 = vld [vmem:[%s1633_s4 + $0x34] ss:$8 sps:$4 sm:$0xff]   ;;  %v1012_v8 = vld [vmem:[%s1633_s4 + $0x30] ss:$8 sps:$4 sm:$0xff]   ;;  %v1013_v9 = vld [vmem:[%s1633_s4 + $0x44] ss:$8 sps:$4 sm:$0xff]  }
  0xb1   : > { %494 = vmatprep.subr.bf16.mxu0 %v1004_v3  ;;  %v1015_v10 = vld [vmem:[%s1633_s4 + $0x40] ss:$8 sps:$4 sm:$0xff]   ;;  %v1016_v11 = vld [vmem:[%s1633_s4 + $0x54] ss:$8 sps:$4 sm:$0xff]   ;;  %v1018_v12 = vld [vmem:[%s1633_s4 + $0x50] ss:$8 sps:$4 sm:$0xff]  }
  0xb2   : > { %v1019_v13 = vld [vmem:[%s1633_s4 + $0x64] ss:$8 sps:$4 sm:$0xff]   ;;  %v292_v14 = vld [vmem:[%s228_s9] sm:$0xff]  ;;  %v1021_v16 = vld [vmem:[%s1633_s4 + $0x60] ss:$8 sps:$4 sm:$0xff]   ;;  %s1819_s18 = sld [smem:[#allocation15_spill]] }
  0xb3   : > { %v816_v15 = vcombine.high %v292_v14, %v292_v14  ;;  %v1022_v17 = vld [vmem:[%s1633_s4 + $0x74] ss:$8 sps:$4 sm:$0xff]   ;;  %v1024_v18 = vld [vmem:[%s1633_s4 + $0x70] ss:$8 sps:$4 sm:$0xff]   ;;  %v1025_v19 = vld [vmem:[%s1633_s4 + $0x84] ss:$8 sps:$4 sm:$0xff]   ;;  %v815_v35 = vcombine.low %v292_v14, %v292_v14 }
  0xb4   : > { %495 = vmatpush1.bf16.msra.mxu0 %v1006_v4  ;;  %v1027_v20 = vld [vmem:[%s1633_s4 + $0x80] ss:$8 sps:$4 sm:$0xff]   ;;  %v1028_v21 = vld [vmem:[%s1633_s4 + $0x94] ss:$8 sps:$4 sm:$0xff]   ;;  %v1030_v22 = vld [vmem:[%s1633_s4 + $0x90] ss:$8 sps:$4 sm:$0xff]  }
  0xb5   : > { %496 = vmatprep.subr.bf16.mxu0 %v1007_v5  ;;  %524 = vmatprep.mubr.bf16.mxu0 %v816_v15  ;;  %v1031_v23 = vld [vmem:[%s1633_s4 + $0xa4] ss:$8 sps:$4 sm:$0xff]   ;;  %v1033_v24 = vld [vmem:[%s1633_s4 + $0xa0] ss:$8 sps:$4 sm:$0xff]   ;;  %v1034_v25 = vld [vmem:[%s1633_s4 + $0xb4] ss:$8 sps:$4 sm:$0xff]  }
  0xb6   : > { %v1036_v26 = vld [vmem:[%s1633_s4 + $0xb0] ss:$8 sps:$4 sm:$0xff]   ;;  %v1037_v27 = vld [vmem:[%s1633_s4 + $0xc4] ss:$8 sps:$4 sm:$0xff]   ;;  %v1039_v28 = vld [vmem:[%s1633_s4 + $0xc0] ss:$8 sps:$4 sm:$0xff]  }
  0xb7   : > { %v1040_v29 = vld [vmem:[%s1633_s4 + $0xd4] ss:$8 sps:$4 sm:$0xff]   ;;  %v1042_v30 = vld [vmem:[%s1633_s4 + $0xd0] ss:$8 sps:$4 sm:$0xff]   ;;  %v1043_v31 = vld [vmem:[%s1633_s4 + $0xe4] ss:$8 sps:$4 sm:$0xff]  }
  0xb8   : > { %497 = vmatpush1.bf16.msra.mxu0 %v1009_v6  ;;  %v1045_v32 = vld [vmem:[%s1633_s4 + $0xe0] ss:$8 sps:$4 sm:$0xff]   ;;  %v1046_v33 = vld [vmem:[%s1633_s4 + $0xf4] ss:$8 sps:$4 sm:$0xff]   ;;  %v1048_v34 = vld [vmem:[%s1633_s4 + $0xf0] ss:$8 sps:$4 sm:$0xff]  }
  0xb9   : > { %498 = vmatprep.subr.bf16.mxu0 %v1010_v7  ;;  %v290_v36 = vld [vmem:[#allocation2] sm:$0xff]  ;;  %v291_v37 = vld [vmem:[#allocation2 + $0x8] sm:$0xff]  ;;  %p849_p7 = scmp.ne.s32.totalorder %s1819_s18, 1 }
  0xbc   : > { %499 = vmatpush1.bf16.msra.mxu0 %v1012_v8 }
  0xbd   : > { %500 = vmatprep.subr.bf16.mxu0 %v1013_v9 }
  0xc0   : > { %501 = vmatpush1.bf16.msra.mxu0 %v1015_v10 }
  0xc1   : > { %502 = vmatprep.subr.bf16.mxu0 %v1016_v11 }
  0xc4   : > { %503 = vmatpush1.bf16.msra.mxu0 %v1018_v12 }
  0xc5   : > { %504 = vmatprep.subr.bf16.mxu0 %v1019_v13 }
  0xc8   : > { %505 = vmatpush1.bf16.msra.mxu0 %v1021_v16  ;;  %v1308_v16 = vmov (!%p849_p7), 1966171168  }
  0xc9   : > { %506 = vmatprep.subr.bf16.mxu0 %v1022_v17  ;;  %v586_v17 = vunpack.c.l.s4 (!%p849_p7), %v1308_v16 }
  0xcc   : > { %507 = vmatpush1.bf16.msra.mxu0 %v1024_v18  ;;  %v588_v18 = vlaneseq (!%p849_p7) }
  0xcd   : > { %508 = vmatprep.subr.bf16.mxu0 %v1025_v19  ;;  %v587_v19 = vunpack.c.0.s8 (!%p849_p7), %v586_v17 }
  0xd0   : > { %509 = vmatpush1.bf16.msra.mxu0 %v1027_v20  ;;  %v589_v20 = vshrl.u32 (!%p849_p7), %v588_v18, 7 }
  0xd1   : > { %510 = vmatprep.subr.bf16.mxu0 %v1028_v21 }
  0xd4   : > { %511 = vmatpush1.bf16.msra.mxu0 %v1030_v22  ;;  %v590_v22 = vsub.s32 (!%p849_p7), %v587_v19, %v589_v20 }
  0xd5   : > { %512 = vmatprep.subr.bf16.mxu0 %v1031_v23 }
  0xd8   : > { %513 = vmatpush1.bf16.msra.mxu0 %v1033_v24 }
  0xd9   : > { %514 = vmatprep.subr.bf16.mxu0 %v1034_v25 }
  0xdc   : > { %515 = vmatpush1.bf16.msra.mxu0 %v1036_v26  ;;  %v575_v26 = vld [vmem:[%s1643_s15] ss:$2 sm:$0x3] (!%p849_p7) }
  0xdd   : > { %516 = vmatprep.subr.bf16.mxu0 %v1037_v27 }
  0xe0   : > { %517 = vmatpush1.bf16.msra.mxu0 %v1039_v28  ;;  %v604_v28 = vsub.s32 (!%p849_p7), 0, %v589_v20 }
  0xe1   : > { %518 = vmatprep.subr.bf16.mxu0 %v1040_v29  ;;  %v608_v29 = vsub.s32 (!%p849_p7), 1, %v589_v20 }
  0xe4   : > { %519 = vmatpush1.bf16.msra.mxu0 %v1042_v30 }
  0xe5   : > { %520 = vmatprep.subr.bf16.mxu0 %v1043_v31 }
  0xe8   : > { %521 = vmatpush1.bf16.msra.mxu0 %v1045_v32 }
  0xe9   : > { %522 = vmatprep.subr.bf16.mxu0 %v1046_v33 }
  0xec   : > { %523 = vmatpush1.bf16.msra.mxu0 %v1048_v34 }
  0xef   : > { %525 = vmatmul.mubr.bf16.vlgmr.msra.gmra.mrb[0].mxu0 %v815_v35 }
 0x1c0   : > { %540 = sbr.rel (%p849_p7) target bundleno = 534 (0x216), region = 52 }
 0x1c2   : > { %v526_v38 = vpop.f32.mrb[0].mxu0 }
 0x1c3   : > { %v533_v39 = vadd.f32 %v526_v38, %v290_v36  ;;  %v528_v40 = vpop.f32.mrb[1].mxu0 }
 0x1c4   : > { %v534_v41 = vadd.f32 %v528_v40, %v291_v37  ;;  %v530_v42 = vpop.f32.mrb[2].mxu0  ;;  %v850_v37 = vld [vmem:[%s1643_s15 + $0x1] ss:$2 sm:$0x3] (!%p849_p7) }
 0x1c5   : > { %535 = vst [vmem:[#allocation2] sm:$0xff] %v533_v39  ;;  %v531_v43 = vpop.f32.mrb[3].mxu0 }
 0x1c6   : > { %536 = vst [vmem:[#allocation2 + $0x8] sm:$0xff] %v534_v41 }
 0x1cc   : > { %v541_v44 = vld [vmem:[#allocation2] sm:$0xff] }
 0x1cd   : > { %v542_v45 = vld [vmem:[#allocation2 + $0x8] sm:$0xff]  ;;  %v543_v46 = vrot.slane %v541_v44, 4 }
 0x1ce   : > { %v549_v47 = vrot.slane %v542_v45, 4 }
 0x1cf   : > { %v544_v48 = vadd.f32 %v543_v46, %v541_v44 }
 0x1d0   : > { %v550_v49 = vadd.f32 %v549_v47, %v542_v45 }
 0x1d1   : > { %v545_v50 = vrot.slane %v544_v48, 2 }
 0x1d2   : > { %v551_v51 = vrot.slane %v550_v49, 2 }
 0x1d3   : > { %v546_v52 = vadd.f32 %v545_v50, %v544_v48 }
 0x1d4   : > { %v552_v53 = vadd.f32 %v551_v51, %v550_v49 }
 0x1d5   : > { %v547_v54 = vrot.slane %v546_v52, 1 }
 0x1d6   : > { %v553_v55 = vrot.slane %v552_v53, 1 }
 0x1d7   : > { %v548_v56 = vadd.f32 %v547_v54, %v546_v52 }
 0x1d8   : > { %v554_v57 = vadd.f32 %v553_v55, %v552_v53 }
 0x1d9   : > { %v555_v58 = vmul.f32 0.125, %v548_v56 }
 0x1da   : > { %v556_v59 = vmul.f32 0.125, %v554_v57 }
 0x1db   : > { %v557_v60 = vsub.f32 %v541_v44, %v555_v58 }
 0x1dc   : > { %v558_v61 = vsub.f32 %v542_v45, %v556_v59 }
 0x1dd   : > { %v559_v62 = vmul.f32 %v557_v60, %v557_v60 }
 0x1de   : > { %v560_v63 = vmul.f32 %v558_v61, %v558_v61 }
 0x1df   : > { %v561_v0 = vrot.slane %v559_v62, 4 }
 0x1e0   : > { %v567_v1 = vrot.slane %v560_v63, 4 }
 0x1e1   : > { %v562_v2 = vadd.f32 %v561_v0, %v559_v62 }
 0x1e2   : > { %v568_v3 = vadd.f32 %v567_v1, %v560_v63 }
 0x1e3   : > { %v563_v4 = vrot.slane %v562_v2, 2 }
 0x1e4   : > { %v569_v5 = vrot.slane %v568_v3, 2 }
 0x1e5   : > { %v564_v6 = vadd.f32 %v563_v4, %v562_v2 }
 0x1e6   : > { %v570_v7 = vadd.f32 %v569_v5, %v568_v3 }
 0x1e7   : > { %v565_v8 = vrot.slane %v564_v6, 1 }
 0x1e8   : > { %v571_v9 = vrot.slane %v570_v7, 1 }
 0x1e9   : > { %v566_v10 = vadd.f32 %v565_v8, %v564_v6 }
 0x1ea   : > { %v572_v11 = vadd.f32 %v571_v9, %v570_v7 }
 0x1eb   : > { %v573_v12 = vmul.f32 0.125, %v566_v10 }
 0x1ec   : > { %v574_v13 = vmul.f32 0.125, %v572_v11 }
 0x1ed   : > { %v578_v14 = vadd.f32 1e-05, %v573_v12 }
 0x1ee   : > { %v579_v15 = vadd.f32 1e-05, %v574_v13 }
 0x1ef   : > { %1051 = vrsqrt.f32 %v578_v14 }
 0x1f0   : > { %1053 = vrsqrt.f32 %v579_v15 }
 0x1f9   : > { %v1052_v21 = vpop.eup %1051 }
 0x1fa   : > { %v1054_v23 = vpop.eup %1053 }
 0x1fb   : > { %v584_v24 = vcombine.low %v1052_v21, %v1054_v23 }
 0x1fd   : > { %v591_v25 = vrot.slane %v584_v24, %v590_v22 }
 0x1ff   : > { %v598_v27 = vrot.slane %v591_v25, %v590_v22 }
 0x201   : > { %v600_v30 = vmul.f32 %v598_v27, %v575_v26 }
 0x203   : > { %v605_v31 = vrot.slane %v600_v30, %v604_v28  ;;  %v609_v32 = vrot.slane %v600_v30, %v608_v29 }
 0x205   : > { %v612_v33 = vmul.f32 %v605_v31, %v555_v58  ;;  %v613_v34 = vmul.f32 %v609_v32, %v556_v59  ;;  %v633_v40 = vmul.f32 %v605_v31, %v541_v44  ;;  %v634_v41 = vmul.f32 %v609_v32, %v542_v45 }
 0x207   : > { %v616_v35 = vcombine.low %v612_v33, %v613_v34 }
 0x209   : > { %v623_v36 = vrot.slane %v616_v35, %v590_v22 }
 0x20b   : > { %v630_v38 = vrot.slane %v623_v36, %v590_v22 }
 0x20d   : > { %v632_v39 = vsub.f32 %v850_v37, %v630_v38 }
 0x20f   : > { %v639_v42 = vrot.slane %v632_v39, %v604_v28  ;;  %v643_v43 = vrot.slane %v632_v39, %v608_v29 }
 0x211   : > { %v646_v46 = vadd.f32 %v639_v42, %v633_v40  ;;  %v647_v47 = vadd.f32 %v643_v43, %v634_v41 }
 0x213   : > { %v648_v48 = vmax.f32 %v646_v46, 0.0  ;;  %v649_v49 = vmax.f32 %v647_v47, 0.0 }
 0x215   : > { %650 = vst [vmem:[%s1650_s22] sm:$0xff] %v648_v48  ;;  %651 = vst [vmem:[%s1650_s22 + $0x8] sm:$0xff] %v649_v49 }
 0x216 PF: > { %s1820_s27 = sld [smem:[#allocation16_spill]]  ;;  %s1821_s9 = sld [smem:[#allocation23_spill]] }
 0x217   : > { %s667_s1 = sshll.u32 %s1650_s22, 4  ;;  %s653_s21 = scalar_lea.sflag [#allocation5], %s1640_s26  ;;  %s668_s1 = int_to_ptr.vmem [resolvable:$true] %s667_s1 }
 0x218   : > { %s1145_s12 = scalar_lea.vmem %s668_s1, 256  ;;  %p1822_p5 = scmp.ne.s32.totalorder %s1809_s8, 0 }
 0x219   : > { %p1146_p13 = scmp.ne.s32.totalorder %s668_s1, %s1145_s12  ;;  %s1309_s4 = smov [#allocation9]  }
 0x21a   : > { %s1149_s29 = sshll.u32 %s1309_s4, 4  ;;  %s1150_s29 = int_to_ptr.vmem [resolvable:$false] %s1149_s29 }
 0x21b   : > { %p1147_p12 = pnand %p1146_p13, %p1822_p5  ;;  %s1151_s15 = scalar_lea.vmem %s1150_s29, 512 }
 0x21c   : > { %s859_s0 = sshll.u32 %s1820_s27, 8  ;;  %p1152_p1 = scmp.lt.s32.totalorder %s668_s1, %s1150_s29 }
 0x21d   : > { %s1696_s3 = scalar_lea.hbm %s1821_s9, %s859_s0  ;;  %p1148_p8 = pneg %p1147_p12 }
 0x21e   : > { %p1153_p9 = scmp.lt.s32.totalorder %s1151_s15, %s1145_s12 }
 0x220   : > { %p1154_p3 = por %p1153_p9, %p1152_p1 }
 0x222   : > { %p1155_p6 = pnand %p1154_p3, %p1148_p8 }
 0x224   : > { %1158 = shalt.err (!%p1155_p6)
}
 0x225   : > { %s1159_s26 = scalar_lea.hbm %s1696_s3, 256  ;;  %s1163_s2 = scalar_lea.hbm %s1821_s9, 512 }
 0x226   : > { %p1160_p4 = scmp.ne.s32.totalorder %s1696_s3, %s1159_s26  ;;  %p1164_p0 = scmp.lt.u32.totalorder %s1696_s3, %s1821_s9 }
 0x227   : > { %p1165_p11 = scmp.lt.u32.totalorder %s1163_s2, %s1159_s26  ;;  %p1167_p13 = scmp.lt.u32.totalorder %s1159_s26, %s1696_s3 }
 0x228   : > { %p1161_p2 = pnand %p1160_p4, %p1822_p5 }
 0x229   : > { %p1166_p7 = por %p1165_p11, %p1164_p0 }
 0x22a   : > { %p1162_p10 = pneg %p1161_p2 }
 0x22b   : > { %p1168_p12 = por %p1167_p13, %p1166_p7 }
 0x22d   : > { %p1169_p8 = pnand %p1168_p12, %p1162_p10 }
 0x22f   : > { %1172 = shalt.err (!%p1169_p8)
}
 0x230   : > { %866 = dma.vmem_to_hbm [thread:$0]  (%p1822_p5), %s668_s1, 256, %s1696_s3, %s653_s21  }
 0x231 PF: > { %s1823_s0 = sld [smem:[#allocation14_spill]]  ;;  %p883_p1 = scmp.ge.s32.totalorder %s1299_s25, 2 }
 0x232   : > { %p1824_p9 = scmp.ne.s32.totalorder %s1810_s6, 0 }
 0x234   : > { %p879_p3 = pnand %p883_p1, %p1824_p9 }
 0x237   : > { %s679_s24 = sand.u32 1, %s1823_s0  }
 0x238   : > { %s680_s5 = scalar_lea.sflag [#allocation5], %s679_s24 }
 0x239   : > { %1242 = dma.done.wait (!%p879_p3), %s680_s5, 256  }
 0x23a   : > { %1244 = vsyncadd (!%p879_p3), %s680_s5, 4294967040  ;;  %s22_s25 = sadd.s32 1, %s1299_s25   ;;  %s1826_s22 = sld [smem:[#allocation17_spill]] }
 0x23b   : > { %p1722_p6 = scmp.ge.s32.totalorder %s22_s25, 6   ;;  %s1827_s8 = sld [smem:[#allocation18_spill]] }
 0x23c   : > { %s1828_s24 = sld [smem:[#allocation19_spill]]  ;;  %s1830_s12 = smov %s1251_s13 }
 0x23d   : > { %s1831_s13 = smov %s1255_s14  ;;  %s1832_s14 = smov %s1567_s7 }
 0x23e   : > { %s1833_s15 = smov %s1263_s16  ;;  %s1834_s16 = smov %s1267_s17 }
 0x23f   : > { %s1835_s17 = smov %s1435_s11  ;;  %s1836_s18 = smov %s1275_s19 }
 0x240   : > { %s1837_s19 = smov %s1279_s20  ;;  %s1838_s20 = smov %s1498_s28 }
 0x241   : > { %s1839_s21 = smov %s1291_s23  ;;  %s1840_s23 = smov %s1827_s8 }
 0x242   :  { %21 = sbr.rel (!%p1722_p6) target bundleno = 17 (0x11), region = 110 }
 0x249   :  { %685 = vsyncpa [#allocation4], 1 }
 0x24a   :  { %687 = vsyncpa [#allocation4 + $0x1], 1 }
 0x24b   :  { %688 = vsyncpa [#allocation7], 1 }
 0x24c   :  { %690 = vsyncpa [#allocation7 + $0x1], 1 }
 0x24d   :  { %691 = vsyncpa [#allocation5], 1 }
 0x24e   :  { %693 = vsyncpa [#allocation5 + $0x1], 1 }

</bundles_post_ra>
